<compile_context>
chip_gen: v6e
topology: v6e:2x2x1
jax: 0.10.0
libtpu: 0.0.40
codegen_flags: <defaults>
</compile_context>

<pallas_src>
from functools import partial

import jax
import jax.numpy as jnp
from jax import lax
from jax.experimental import pallas as pl
from jax.experimental.pallas import tpu as pltpu


def mlp_critic_kernel(x_ref, w1_ref, b1_ref, w2_ref, b2_ref, w3_ref,
                      shift_ref, o_ref, *, matmul_dtype):
    # x_ref:  (tm, obs_dim)  -- native layout, batch on sublanes of the tile
    # w1_ref: (h1, obs_dim)  b1_ref: (h1, 1) f32
    # w2_ref: (h2, h1)       b2_ref: (h2, 1) f32
    # w3_ref: (h2, 1) f32    (std already folded in)
    # shift_ref: (1,) f32 in SMEM  (= b3*std + mean, or b3 when normalize=True)
    # o_ref:  (1, tm)        -- lane-dense output tile

    x = x_ref[...].astype(matmul_dtype)            # in-kernel cast (VPU, cheap)

    # layer 1: (h1, tm) = W1 @ x^T -- contract over obs; batch stays on lanes.
    h = lax.dot_general(w1_ref[...], x,
                        dimension_numbers=(((1,), (1,)), ((), ())),
                        preferred_element_type=jnp.float32)
    # f32 bias-add + tanh (kept f32 so the same kernel is safe on v5e's VPU/EUP;
    # on v6e/v7x a bf16 tanh would roughly double EUP throughput).
    h = jnp.tanh(h + b1_ref[...])

    # layer 2: (h2, tm)
    h = jnp.dot(w2_ref[...], h.astype(matmul_dtype),
                preferred_element_type=jnp.float32)
    h = jnp.tanh(h + b2_ref[...])

    # width-1 output layer: VPU multiply + cross-sublane reduce instead of an
    # N=1 MXU pass.  std is folded into w3; b3*std + mean is the SMEM shift.
    v = jnp.sum(h * w3_ref[...], axis=0, keepdims=True)        # (1, tm) f32
    o_ref[...] = v + shift_ref[0]


def mlp_critic_forward(x, params, std, mean, normalize=False,
                       block_batch=1024, matmul_dtype=jnp.bfloat16):
    """params = (w1, b1, w2, b2, w3, b3) in PyTorch (out, in) layout:
         w1 (h1, obs)  b1 (h1, 1)
         w2 (h2, h1)   b2 (h2, 1)
         w3 (h2, 1)    b3 ()
    """
    w1, b1, w2, b2, w3, b3 = params
    batch, obs_dim = x.shape

    # --- fold: (h.w3 + b3)*std + mean  ==  h.(w3*std) + (b3*std + mean)
    if normalize:
        scale = jnp.float32(1.0)
        shift = jnp.float32(0.0)
    else:
        scale = jnp.asarray(std, jnp.float32).reshape(())
        shift = jnp.asarray(mean, jnp.float32).reshape(())
    b3s = jnp.asarray(b3, jnp.float32).reshape(())
    w3_s = w3.astype(jnp.float32) * scale                       # (h2, 1)
    shift_s = (b3s * scale + shift).astype(jnp.float32).reshape(1)   # (1,) SMEM

    # --- batch tile selection: as big as block_batch allows (multiple of 128),
    #     but keep >= 2 tiles when the batch spans >= 256 rows (v7x megacore).
    block_batch = max(128, (block_batch // 128) * 128)
    b128 = pl.cdiv(batch, 128) * 128
    tm = min(block_batch, b128)
    if b128 >= 256 and pl.cdiv(b128, tm) < 2:
        tm = pl.cdiv(pl.cdiv(b128, 2), 128) * 128
    grid = pl.cdiv(batch, tm)

    # --- weights: bf16 MXU operands (f32 accumulate); biases stay f32.
    w1m = w1.astype(matmul_dtype)
    w2m = w2.astype(matmul_dtype)
    b1f = b1.astype(jnp.float32)
    b2f = b2.astype(jnp.float32)

    const2 = lambda i: (0, 0)
    out = pl.pallas_call(
        partial(mlp_critic_kernel, matmul_dtype=matmul_dtype),
        out_shape=jax.ShapeDtypeStruct((1, grid * tm), jnp.float32),
        grid=(grid,),
        in_specs=[
            pl.BlockSpec((tm, obs_dim), lambda i: (i, 0)),      # x, native layout
            pl.BlockSpec(w1m.shape, const2),                    # VMEM-resident weights
            pl.BlockSpec(b1f.shape, const2),
            pl.BlockSpec(w2m.shape, const2),
            pl.BlockSpec(b2f.shape, const2),
            pl.BlockSpec(w3_s.shape, const2),
            pl.BlockSpec(memory_space=pltpu.MemorySpace.SMEM),  # (1,) shift scalar
        ],
        out_specs=pl.BlockSpec((1, tm), lambda i: (0, i)),      # lane-dense output
        compiler_params=pltpu.CompilerParams(
            dimension_semantics=("parallel",)),
    )(x, w1m, b1f, w2m, b2f, w3_s, shift_s)

    # out-of-bounds tail columns (if batch % tm != 0) are discarded here.
    return out[0, :batch].reshape(batch, 1)


def init_params(key, obs_dim, hidden_sizes):
    """Deterministic init mimicking nn.Linear's uniform(-1/sqrt(in), 1/sqrt(in))."""
    sizes = [obs_dim] + list(hidden_sizes) + [1]
    params = []
    for j in range(len(sizes) - 1):
        fan_in, fan_out = sizes[j], sizes[j + 1]
        key, kw, kb = jax.random.split(key, 3)
        bound = 1.0 / jnp.sqrt(fan_in)
        w = jax.random.uniform(kw, (fan_out, fan_in), jnp.float32, -bound, bound)
        b = jax.random.uniform(kb, (fan_out, 1), jnp.float32, -bound, bound)
        params += [w, b]
    w1, b1, w2, b2, w3, b3 = params
    return (w1, b1, w2, b2, w3.reshape(-1, 1), b3.reshape(()))


def reference_forward(x, params, std, mean, normalize=False):
    w1, b1, w2, b2, w3, b3 = params
    h = jnp.tanh(x @ w1.T + b1[:, 0])
    h = jnp.tanh(h @ w2.T + b2[:, 0])
    v = h @ w3 + b3
    if normalize:
        return v
    return v * std + mean


if __name__ == "__main__":
    obs_dim = 32
    hidden_sizes = [64, 64]
    batch = 300          # non-multiple of the tile -> exercises edge blocks + 2-tile grid

    key = jax.random.PRNGKey(0)
    key, kx = jax.random.split(key)
    x = jax.random.normal(kx, (batch, obs_dim), jnp.float32)

    params = init_params(key, obs_dim, hidden_sizes)
    std = jnp.float32(2.5)    # buffer 'std'  (module default is 1.0)
    mean = jnp.float32(-0.7)  # buffer 'mean' (module default is 0.0)

    ref = reference_forward(x, params, std, mean, normalize=False)
    ref_n = reference_forward(x, params, std, mean, normalize=True)

    # exact f32 path (denormalized output)
    out_f32 = mlp_critic_forward(x, params, std, mean, normalize=False,
                                 matmul_dtype=jnp.float32)
    out_f32 = jax.block_until_ready(out_f32)
    assert out_f32.shape == (batch, 1)
    assert jnp.allclose(out_f32, ref, atol=1e-5, rtol=1e-5), "f32 denorm path mismatch"

    # default bf16-MXU path (f32 accumulate / bias / tanh / reduce / affine)
    out_bf = mlp_critic_forward(x, params, std, mean, normalize=False)
    out_bf = jax.block_until_ready(out_bf)
    assert out_bf.shape == (batch, 1)
    assert jnp.allclose(out_bf, ref, atol=5e-2, rtol=5e-2), "bf16 denorm path mismatch"

    # normalize=True path (scale=1, shift=b3; fold must still be correct)
    out_n = mlp_critic_forward(x, params, std, mean, normalize=True,
                               matmul_dtype=jnp.float32)
    out_n = jax.block_until_ready(out_n)
    assert jnp.allclose(out_n, ref_n, atol=1e-5, rtol=1e-5), "normalize path mismatch"

    print("KERNEL_OK")
</pallas_src>

<mosaic_0001>
module attributes {stable_mosaic.version = 11 : i64} {
  func.func @mlp_critic_kernel(%arg0: i32, %arg1: memref<256x32xf32, #tpu.memory_space<vmem>>, %arg2: memref<64x32xf32, #tpu.memory_space<vmem>>, %arg3: memref<64x1xf32, #tpu.memory_space<vmem>>, %arg4: memref<64x64xf32, #tpu.memory_space<vmem>>, %arg5: memref<64x1xf32, #tpu.memory_space<vmem>>, %arg6: memref<64x1xf32, #tpu.memory_space<vmem>>, %arg7: memref<1xf32, #tpu.memory_space<smem>>, %arg8: memref<1x256xf32, #tpu.memory_space<vmem>>) attributes {dimension_semantics = [#tpu.dimension_semantics<parallel>], iteration_bounds = array<i64: 2>, scalar_prefetch = 0 : i64, scratch_operands = 0 : i64, tpu.core_type = #tpu.core_type<tc>, window_params = [{transform_indices = @transform_0, window_bounds = array<i64: 256, 32>}, {pipeline_mode = #tpu.pipeline_mode<synchronous>, transform_indices = @transform_1, window_bounds = array<i64: 64, 32>}, {pipeline_mode = #tpu.pipeline_mode<synchronous>, transform_indices = @transform_2, window_bounds = array<i64: 64, 1>}, {pipeline_mode = #tpu.pipeline_mode<synchronous>, transform_indices = @transform_3, window_bounds = array<i64: 64, 64>}, {pipeline_mode = #tpu.pipeline_mode<synchronous>, transform_indices = @transform_4, window_bounds = array<i64: 64, 1>}, {pipeline_mode = #tpu.pipeline_mode<synchronous>, transform_indices = @transform_5, window_bounds = array<i64: 64, 1>}, {transform_indices = @transform_6, window_bounds = array<i64: 1>}, {transform_indices = @transform_7, window_bounds = array<i64: 1, 256>}]} {
    %c0 = arith.constant 0 : index
    %c0_0 = arith.constant 0 : index
    %0 = vector.load %arg1[%c0, %c0_0] : memref<256x32xf32, #tpu.memory_space<vmem>>, vector<256x32xf32>
    %c0_1 = arith.constant 0 : index
    %c0_2 = arith.constant 0 : index
    %1 = vector.load %arg2[%c0_1, %c0_2] : memref<64x32xf32, #tpu.memory_space<vmem>>, vector<64x32xf32>
    %cst = arith.constant dense<0.000000e+00> : vector<64x256xf32>
    %2 = tpu.matmul %1, %0, %cst {dimension_numbers = #tpu.dot_dimension_numbers<[1], [1], [0], [0], [0, 0, 1, 0], [], []>} : vector<64x32xf32>, vector<256x32xf32>, vector<64x256xf32> -> vector<64x256xf32>
    %c0_3 = arith.constant 0 : index
    %c0_4 = arith.constant 0 : index
    %3 = vector.load %arg3[%c0_3, %c0_4] : memref<64x1xf32, #tpu.memory_space<vmem>>, vector<64x1xf32>
    %4 = vector.broadcast %3 : vector<64x1xf32> to vector<64x256xf32>
    %5 = arith.addf %2, %4 : vector<64x256xf32>
    %6 = math.tanh %5 : vector<64x256xf32>
    %c0_5 = arith.constant 0 : index
    %c0_6 = arith.constant 0 : index
    %7 = vector.load %arg4[%c0_5, %c0_6] : memref<64x64xf32, #tpu.memory_space<vmem>>, vector<64x64xf32>
    %cst_7 = arith.constant dense<0.000000e+00> : vector<64x256xf32>
    %8 = tpu.matmul %7, %6, %cst_7 {dimension_numbers = #tpu.dot_dimension_numbers<[1], [0], [0], [1], [0, 0, 1, 1], [], []>} : vector<64x64xf32>, vector<64x256xf32>, vector<64x256xf32> -> vector<64x256xf32>
    %c0_8 = arith.constant 0 : index
    %c0_9 = arith.constant 0 : index
    %9 = vector.load %arg5[%c0_8, %c0_9] : memref<64x1xf32, #tpu.memory_space<vmem>>, vector<64x1xf32>
    %10 = vector.broadcast %9 : vector<64x1xf32> to vector<64x256xf32>
    %11 = arith.addf %8, %10 : vector<64x256xf32>
    %12 = math.tanh %11 : vector<64x256xf32>
    %c0_10 = arith.constant 0 : index
    %c0_11 = arith.constant 0 : index
    %13 = vector.load %arg6[%c0_10, %c0_11] : memref<64x1xf32, #tpu.memory_space<vmem>>, vector<64x1xf32>
    %14 = vector.broadcast %13 : vector<64x1xf32> to vector<64x256xf32>
    %15 = arith.mulf %12, %14 : vector<64x256xf32>
    %cst_12 = arith.constant dense<0.000000e+00> : vector<256xf32>
    %16 = vector.multi_reduction <add>, %15, %cst_12 [0] : vector<64x256xf32> to vector<256xf32>
    %17 = vector.shape_cast %16 : vector<256xf32> to vector<1x256xf32>
    %c0_13 = arith.constant 0 : index
    %18 = memref.load %arg7[%c0_13] : memref<1xf32, #tpu.memory_space<smem>>
    %19 = vector.broadcast %18 : f32 to vector<1x256xf32>
    %20 = arith.addf %17, %19 : vector<1x256xf32>
    %c0_14 = arith.constant 0 : index
    %c0_15 = arith.constant 0 : index
    %21 = vector.load %arg8[%c0_14, %c0_15] : memref<1x256xf32, #tpu.memory_space<vmem>>, vector<1x256xf32>
    tpu.vector_store %arg8[%c0_14, %c0_15], %20 {strides = array<i32>} : memref<1x256xf32, #tpu.memory_space<vmem>>, vector<1x256xf32>,
    return
  }
  func.func @transform_0(%arg0: i32) -> (i32, i32) {
    %c0_i32 = arith.constant 0 : i32
    %c0_i32_0 = arith.constant 0 : i32
    return %arg0, %c0_i32 : i32, i32
  }
  func.func @transform_1(%arg0: i32) -> (i32, i32) {
    %c0_i32 = arith.constant 0 : i32
    %c0_i32_0 = arith.constant 0 : i32
    %c0_i32_1 = arith.constant 0 : i32
    return %c0_i32, %c0_i32_0 : i32, i32
  }
  func.func @transform_2(%arg0: i32) -> (i32, i32) {
    %c0_i32 = arith.constant 0 : i32
    %c0_i32_0 = arith.constant 0 : i32
    %c0_i32_1 = arith.constant 0 : i32
    return %c0_i32, %c0_i32_0 : i32, i32
  }
  func.func @transform_3(%arg0: i32) -> (i32, i32) {
    %c0_i32 = arith.constant 0 : i32
    %c0_i32_0 = arith.constant 0 : i32
    %c0_i32_1 = arith.constant 0 : i32
    return %c0_i32, %c0_i32_0 : i32, i32
  }
  func.func @transform_4(%arg0: i32) -> (i32, i32) {
    %c0_i32 = arith.constant 0 : i32
    %c0_i32_0 = arith.constant 0 : i32
    %c0_i32_1 = arith.constant 0 : i32
    return %c0_i32, %c0_i32_0 : i32, i32
  }
  func.func @transform_5(%arg0: i32) -> (i32, i32) {
    %c0_i32 = arith.constant 0 : i32
    %c0_i32_0 = arith.constant 0 : i32
    %c0_i32_1 = arith.constant 0 : i32
    return %c0_i32, %c0_i32_0 : i32, i32
  }
  func.func @transform_6(%arg0: i32) -> i32 {
    %c0_i32 = arith.constant 0 : i32
    %c0_i32_0 = arith.constant 0 : i32
    return %c0_i32 : i32
  }
  func.func @transform_7(%arg0: i32) -> (i32, i32) {
    %c0_i32 = arith.constant 0 : i32
    %c0_i32_0 = arith.constant 0 : i32
    return %c0_i32, %arg0 : i32, i32
  }
}

</mosaic_0001>

<bundles_post_ra>
// kernel: tpu_custom_call.1
= control target key start
LH: loop header
LB: loop body
LE: loop exit
PB: predicated region body
PF: predicated region fallthrough
CT: control target
= control target key end

     0   :  { %s1674_s0 = inlined_call_operand.vmem [shape: f32[300,32], index: 0, kind: input, shape index: {}]   ;;  %s1675_s1 = inlined_call_operand.vmem [shape: f32[64,32], index: 1, kind: input, shape index: {}]   ;;  %s1676_s2 = inlined_call_operand.vmem [shape: f32[64,1], index: 2, kind: input, shape index: {}]   ;;  %s1677_s3 = inlined_call_operand.vmem [shape: f32[64,64], index: 3, kind: input, shape index: {}]   ;;  %s1678_s4 = inlined_call_operand.vmem [shape: f32[64,1], index: 4, kind: input, shape index: {}]   ;;  %s1679_s5 = inlined_call_operand.vmem [shape: f32[64,1], index: 5, kind: input, shape index: {}]   ;;  %s1680_s6 = inlined_call_operand.<no memory space> [shape: f32[1], index: 6, kind: input, shape index: {}]   ;;  %s1681_s7 = inlined_call_operand.hbm [shape: f32[1,512], index: 7, kind: output, shape index: {}]  }
   0x1   :  { %12 = sst [smem:[#allocation2]] %s1680_s6 }
   0x2   :  { %13 = vsyncpa [#allocation4], 0 }
   0x3   :  { %15 = vsyncpa [#allocation4 + $0x1], 0  ;;  %s1366_s26 = smov 0   ;;  %s1368_s27 = smov 0  }
   0x4   :  { %s1370_s28 = smov 0   ;;  %s1372_s29 = smov 0  }
   0x5 LB: > { %s1039_s6 = sadd.s32 4294967295, %s1317_s29   ;;  %s1040_s30 = sadd.s32 4294967294, %s1317_s29   ;;  %s1317_s29 = sphi %s1372_s29, %s1687_s29   ;;  %s1313_s28 = sphi %s1370_s28, %s1686_s28   ;;  %s1309_s27 = sphi %s1368_s27, %s1685_s27   ;;  %s1305_s26 = sphi %s1366_s26, %s1684_s26  }
   0x6   : > { %s1389_s8 = sadd.s32 1, %s1317_s29   ;;  %s180_s9 = sadd.s32 1, %s1313_s28 }
   0x7   : > { %s177_s10 = ssub.s32 %s1317_s29, %s1389_s8  ;;  %p190_p0 = scmp.ne.s32.totalorder %s1313_s28, %s1309_s27 }
   0x8   : > { %p178_p1 = scmp.eq.s32.totalorder %s177_s10, 0  ;;  %p191_p2 = scmp.eq.s32.totalorder %s1039_s6, 1 }
   0x9   : > { %p196_p3 = scmp.ne.s32.totalorder %s1309_s27, %s1305_s26  ;;  %p197_p4 = scmp.eq.s32.totalorder %s1040_s30, 1 }
   0xa   : > { %s1399_s11 = scalar_select %p178_p1, %s1313_s28, %s180_s9  }
   0xb   : > { %p1401_p5 = por %p191_p2, %p190_p0  ;;  %p1405_p6 = por %p197_p4, %p196_p3 }
   0xc   : > { %p1043_p7 = scmp.ge.s32.totalorder %s1317_s29, 1  ;;  %p250_p8 = scmp.lt.s32.totalorder %s1317_s29, 3 }
   0xe   : > { %p251_p9 = pnand %p1043_p7, %p250_p8 }
   0xf   : > { %s1411_s14 = sshll.u32 (!%p251_p9), %s1039_s6, 5  ;;  %s939_s30 = sld [smem:[#allocation2]] (!%p251_p9) }
  0x10   : > { %254 = sbr.rel (%p251_p9) target bundleno = 621 (0x26d), region = 48  ;;  %p291_p10 = scmp.lt.s32.totalorder (!%p251_p9), %s1411_s14, 37 }
  0x11   : > { %s283_s9 = sand.u32 (!%p251_p9), 1, %s1309_s27   ;;  %s1322_s22 = smov (!%p251_p9), [#allocation3]  }
  0x12   : > { %s1044_s15 = sshll.u32 (!%p251_p9), %s283_s9, 1  ;;  %s967_s20 = scalar_lea.sflag (!%p251_p9), [#allocation4], %s283_s9 }
  0x13   : > { %s285_s16 = scalar_lea.vmem (!%p251_p9), [#allocation3], %s1044_s15  ;;  %s1261_s23 = sshll.u32 (!%p251_p9), %s1322_s22, 4  ;;  %s1262_s23 = int_to_ptr.vmem [resolvable:$false] %s1261_s23 }
  0x15   : > { %vm389_vm0 = vcmask 261120   ;;  %v1416_v0 = vld [vmem:[%s1675_s1] sm:$0xff]  ;;  %v1319_v1 = vmov 0   ;;  %v348_v2 = vld [vmem:[%s1676_s2 + $0x38] sm:$0xff]  ;;  %s292_s19 = scalar_select %p291_p10, %s1411_s14, 37  ;;  %v346_v3 = vld [vmem:[%s1676_s2 + $0x28] sm:$0xff] }
  0x16   : > { %1133 = vmatprep.mubr.msk.f32.mxu0 %vm389_vm0, %v1416_v0  ;;  %1191 = vset.pattern.permute.xlu0 %v1319_v1  ;;  %v347_v4 = vld [vmem:[%s1676_s2 + $0x30] sm:$0xff]  ;;  %v345_v5 = vld [vmem:[%s1676_s2 + $0x20] sm:$0xff]  ;;  %v344_v9 = vld [vmem:[%s1676_s2 + $0x18] sm:$0xff]  ;;  %vm695_vm1 = vcmask 523264  }
  0x17   : > { %1192 = vset.pattern.permute.xlu1 %v1319_v1  ;;  %386 = vperm.xlu0 %1191, %v348_v2   ;;  %s1046_s24 = sshll.u32 %s292_s19, 3  ;;  %v343_v10 = vld [vmem:[%s1676_s2 + $0x10] sm:$0xff]  ;;  %v342_v13 = vld [vmem:[%s1676_s2 + $0x8] sm:$0xff]  ;;  %v341_v14 = vld [vmem:[%s1676_s2] sm:$0xff]  ;;  %v1320_v1 = vmov 0.0   ;;  %s979_s19 = scalar_lea.hbm %s1681_s7, %s1411_s14 }
  0x18   : > { %376 = vperm.xlu1 %1192, %v346_v3   ;;  %s1437_s10 = scalar_lea.vmem %s1674_s0, %s1046_s24  ;;  %v647_v17 = vld [vmem:[%s1678_s4] sm:$0xff]  ;;  %v648_v18 = vld [vmem:[%s1678_s4 + $0x8] sm:$0xff]  ;;  %v649_v21 = vld [vmem:[%s1678_s4 + $0x10] sm:$0xff]  ;;  %784 = vmatprep.mubr.f32.mxu1 %v1320_v1  ;;  %s1263_s24 = scalar_lea.vmem %s1262_s23, 64 }
  0x19   : > { %v332_v6 = vld [vmem:[%s1437_s10 + $0xf8] sm:$0xff]  ;;  %v331_v8 = vld [vmem:[%s1437_s10 + $0xf0] sm:$0xff]  ;;  %v330_v12 = vld [vmem:[%s1437_s10 + $0xe8] sm:$0xff] }
  0x1a   : > { %v316_v7 = vld [vmem:[%s1437_s10 + $0x78] sm:$0xff]  ;;  %1101 = vmatprep.subr.msk.mxu0 %vm389_vm0, %v332_v6  ;;  %v315_v11 = vld [vmem:[%s1437_s10 + $0x70] sm:$0xff]  ;;  %v314_v15 = vld [vmem:[%s1437_s10 + $0x68] sm:$0xff] }
  0x1b   : > { %381 = vperm.xlu0 %1191, %v347_v4   ;;  %1102 = vmatpush3.xpose.msk.msra.mxu0 %vm389_vm0, %v316_v7  ;;  %v329_v16 = vld [vmem:[%s1437_s10 + $0xe0] sm:$0xff]  ;;  %v328_v20 = vld [vmem:[%s1437_s10 + $0xd8] sm:$0xff]  ;;  %v327_v24 = vld [vmem:[%s1437_s10 + $0xd0] sm:$0xff] }
  0x1c   : > { %371 = vperm.xlu1 %1192, %v345_v5   ;;  %1103 = vmatprep.subr.msk.mxu0 %vm389_vm0, %v331_v8  ;;  %v313_v19 = vld [vmem:[%s1437_s10 + $0x60] sm:$0xff]  ;;  %v650_v22 = vld [vmem:[%s1678_s4 + $0x18] sm:$0xff]  ;;  %v652_v26 = vld [vmem:[%s1678_s4 + $0x28] sm:$0xff] }
  0x1d   : > { %v312_v23 = vld [vmem:[%s1437_s10 + $0x58] sm:$0xff]  ;;  %v651_v25 = vld [vmem:[%s1678_s4 + $0x20] sm:$0xff]  ;;  %v311_v27 = vld [vmem:[%s1437_s10 + $0x50] sm:$0xff] }
  0x1e   : > { %v326_v28 = vld [vmem:[%s1437_s10 + $0xc8] sm:$0xff]  ;;  %v653_v29 = vld [vmem:[%s1678_s4 + $0x30] sm:$0xff]  ;;  %v654_v30 = vld [vmem:[%s1678_s4 + $0x38] sm:$0xff] }
  0x1f   : > { %366 = vperm.xlu0 %1191, %v344_v9   ;;  %1104 = vmatpush3.xpose.msk.msra.mxu0 %vm389_vm0, %v315_v11  ;;  %v310_v31 = vld [vmem:[%s1437_s10 + $0x48] sm:$0xff]  ;;  %v325_v32 = vld [vmem:[%s1437_s10 + $0xc0] sm:$0xff]  ;;  %v324_v36 = vld [vmem:[%s1437_s10 + $0xb8] sm:$0xff] }
  0x20   : > { %361 = vperm.xlu1 %1192, %v343_v10   ;;  %1105 = vmatprep.subr.msk.mxu0 %vm389_vm0, %v330_v12  ;;  %v849_v33 = vld [vmem:[%s1679_s5] sm:$0xff]  ;;  %v850_v34 = vld [vmem:[%s1679_s5 + $0x8] sm:$0xff]  ;;  %v851_v37 = vld [vmem:[%s1679_s5 + $0x10] sm:$0xff] }
  0x21   : > { %v309_v35 = vld [vmem:[%s1437_s10 + $0x40] sm:$0xff]  ;;  %v852_v38 = vld [vmem:[%s1679_s5 + $0x18] sm:$0xff]  ;;  %v323_v40 = vld [vmem:[%s1437_s10 + $0xb0] sm:$0xff] }
  0x22   : > { %v308_v39 = vld [vmem:[%s1437_s10 + $0x38] sm:$0xff]  ;;  %v853_v41 = vld [vmem:[%s1679_s5 + $0x20] sm:$0xff]  ;;  %v854_v42 = vld [vmem:[%s1679_s5 + $0x28] sm:$0xff] }
  0x23   : > { %356 = vperm.xlu0 %1191, %v342_v13   ;;  %1106 = vmatpush3.xpose.msk.msra.mxu0 %vm389_vm0, %v314_v15  ;;  %v307_v43 = vld [vmem:[%s1437_s10 + $0x30] sm:$0xff]  ;;  %v322_v44 = vld [vmem:[%s1437_s10 + $0xa8] sm:$0xff]  ;;  %v856_v46 = vld [vmem:[%s1679_s5 + $0x38] sm:$0xff] }
  0x24   : > { %351 = vperm.xlu1 %1192, %v341_v14   ;;  %1107 = vmatprep.subr.msk.mxu0 %vm389_vm0, %v329_v16  ;;  %v855_v45 = vld [vmem:[%s1679_s5 + $0x30] sm:$0xff]  ;;  %v306_v47 = vld [vmem:[%s1437_s10 + $0x28] sm:$0xff]  ;;  %v321_v48 = vld [vmem:[%s1437_s10 + $0xa0] sm:$0xff] }
  0x25   : > { %v305_v49 = vld [vmem:[%s1437_s10 + $0x20] sm:$0xff]  ;;  %v320_v50 = vld [vmem:[%s1437_s10 + $0x98] sm:$0xff]  ;;  %v319_v52 = vld [vmem:[%s1437_s10 + $0x90] sm:$0xff] }
  0x26   : > { %v304_v51 = vld [vmem:[%s1437_s10 + $0x18] sm:$0xff]  ;;  %v303_v53 = vld [vmem:[%s1437_s10 + $0x10] sm:$0xff]  ;;  %v318_v54 = vld [vmem:[%s1437_s10 + $0x88] sm:$0xff] }
  0x27   : > { %657 = vperm.xlu0 %1191, %v647_v17   ;;  %1108 = vmatpush3.xpose.msk.msra.mxu0 %vm389_vm0, %v313_v19  ;;  %v302_v55 = vld [vmem:[%s1437_s10 + $0x8] sm:$0xff]  ;;  %v317_v56 = vld [vmem:[%s1437_s10 + $0x80] sm:$0xff]  ;;  %v335_v59 = vld [vmem:[%s1675_s1 + $0x10] sm:$0xff] }
  0x28   : > { %662 = vperm.xlu1 %1192, %v648_v18   ;;  %1109 = vmatprep.subr.msk.mxu0 %vm389_vm0, %v328_v20  ;;  %v301_v57 = vld [vmem:[%s1437_s10] sm:$0xff]  ;;  %v334_v58 = vld [vmem:[%s1675_s1 + $0x8] sm:$0xff]  ;;  %v336_v60 = vld [vmem:[%s1675_s1 + $0x18] sm:$0xff]  ;;  %s981_s10 = sshll.u32 %s285_s16, 4  ;;  %s982_s10 = int_to_ptr.vmem [resolvable:$true] %s981_s10 }
  0x29   : > { %v337_v61 = vld [vmem:[%s1675_s1 + $0x20] sm:$0xff]  ;;  %v338_v62 = vld [vmem:[%s1675_s1 + $0x28] sm:$0xff]  ;;  %v339_v63 = vld [vmem:[%s1675_s1 + $0x30] sm:$0xff]  ;;  %s1257_s21 = scalar_lea.vmem %s982_s10, 32  ;;  %p1264_p0 = scmp.lt.s32.totalorder %s982_s10, %s1262_s23 }
  0x2a   : > { %p1258_p11 = scmp.ne.s32.totalorder %s982_s10, %s1257_s21  ;;  %p1265_p1 = scmp.lt.s32.totalorder %s1263_s24, %s1257_s21 }
  0x2b   : > { %667 = vperm.xlu0 %1191, %v649_v21   ;;  %1110 = vmatpush3.xpose.msk.msra.mxu0 %vm389_vm0, %v312_v23 }
  0x2c   : > { %672 = vperm.xlu1 %1192, %v650_v22   ;;  %1111 = vmatprep.subr.msk.mxu0 %vm389_vm0, %v327_v24  ;;  %p1259_p12 = pnand %p1258_p11, %p1401_p5  ;;  %p1266_p2 = por %p1265_p1, %p1264_p0 }
  0x2e   : > { %p1260_p13 = pneg %p1259_p12 }
  0x2f   : > { %677 = vperm.xlu0 %1191, %v651_v25   ;;  %1112 = vmatpush3.xpose.msk.msra.mxu0 %vm389_vm0, %v311_v27 }
  0x30   : > { %682 = vperm.xlu1 %1192, %v652_v26   ;;  %1113 = vmatprep.subr.msk.mxu0 %vm389_vm0, %v326_v28  ;;  %p1267_p3 = pnand %p1266_p2, %p1260_p13 }
  0x33   : > { %687 = vperm.xlu0 %1191, %v653_v29   ;;  %1114 = vmatpush3.xpose.msk.msra.mxu0 %vm389_vm0, %v310_v31 }
  0x34   : > { %692 = vperm.xlu1 %1192, %v654_v30   ;;  %1115 = vmatprep.subr.msk.mxu0 %vm389_vm0, %v325_v32 }
  0x37   : > { %859 = vperm.xlu0 %1191, %v849_v33   ;;  %1116 = vmatpush3.xpose.msk.msra.mxu0 %vm389_vm0, %v309_v35 }
  0x38   : > { %864 = vperm.xlu1 %1192, %v850_v34   ;;  %1117 = vmatprep.subr.msk.mxu0 %vm389_vm0, %v324_v36 }
  0x3b   : > { %869 = vperm.xlu0 %1191, %v851_v37   ;;  %1118 = vmatpush3.xpose.msk.msra.mxu0 %vm389_vm0, %v308_v39 }
  0x3c   : > { %874 = vperm.xlu1 %1192, %v852_v38   ;;  %1119 = vmatprep.subr.msk.mxu0 %vm389_vm0, %v323_v40 }
  0x3f   : > { %879 = vperm.xlu0 %1191, %v853_v41   ;;  %1120 = vmatpush3.xpose.msk.msra.mxu0 %vm389_vm0, %v307_v43 }
  0x40   : > { %884 = vperm.xlu1 %1192, %v854_v42   ;;  %1121 = vmatprep.subr.msk.mxu0 %vm389_vm0, %v322_v44 }
  0x43   : > { %889 = vperm.xlu0 %1191, %v855_v45   ;;  %1122 = vmatpush3.xpose.msk.msra.mxu0 %vm389_vm0, %v306_v47 }
  0x44   : > { %894 = vperm.xlu1 %1192, %v856_v46   ;;  %1123 = vmatprep.subr.msk.mxu0 %vm389_vm0, %v321_v48 }
  0x47   : > { %1124 = vmatpush3.xpose.msk.msra.mxu0 %vm389_vm0, %v305_v49 }
  0x48   : > { %1125 = vmatprep.subr.msk.mxu0 %vm389_vm0, %v320_v50 }
  0x4b   : > { %1126 = vmatpush3.xpose.msk.msra.mxu0 %vm389_vm0, %v304_v51 }
  0x4c   : > { %1127 = vmatprep.subr.msk.mxu0 %vm389_vm0, %v319_v52 }
  0x4f   : > { %1128 = vmatpush3.xpose.msk.msra.mxu0 %vm389_vm0, %v303_v53 }
  0x50   : > { %1129 = vmatprep.subr.msk.mxu0 %vm389_vm0, %v318_v54 }
  0x53   : > { %1130 = vmatpush3.xpose.msk.msra.mxu0 %vm389_vm0, %v302_v55 }
  0x54   : > { %1131 = vmatprep.subr.msk.mxu0 %vm389_vm0, %v317_v56 }
  0x57   : > { %1132 = vmatpush3.xpose.msk.msra.mxu0 %vm389_vm0, %v301_v57  ;;  %v639_v57 = vld [vmem:[%s1677_s3] sm:$0xff] }
  0x5a   : > { %1134 = vmatmul.mubr.msk.f32.vlgmr.msra.gmra.mxu0 %vm389_vm0, %v1416_v0  ;;  %v340_v0 = vld [vmem:[%s1675_s1 + $0x38] sm:$0xff] }
  0x5b   : > { %1135 = vmatprep.mubr.msk.f32.mxu0 %vm389_vm0, %v334_v58 }
  0x5e   : > { %1136 = vmatmul.mubr.msk.f32.gmra.mxu0 %vm389_vm0, %v334_v58 }
  0x5f   : > { %1137 = vmatprep.mubr.msk.f32.mxu0 %vm389_vm0, %v335_v59 }
  0x62   : > { %1138 = vmatmul.mubr.msk.f32.gmra.mxu0 %vm389_vm0, %v335_v59  ;;  %v640_v59 = vld [vmem:[%s1677_s3 + $0x8] sm:$0xff] }
  0x63   : > { %1139 = vmatprep.mubr.msk.f32.mxu0 %vm389_vm0, %v336_v60 }
  0x66   : > { %1140 = vmatmul.mubr.msk.f32.gmra.mxu0 %vm389_vm0, %v336_v60  ;;  %v641_v60 = vld [vmem:[%s1677_s3 + $0x10] sm:$0xff] }
  0x67   : > { %1141 = vmatprep.mubr.msk.f32.mxu0 %vm389_vm0, %v337_v61 }
  0x6a   : > { %1142 = vmatmul.mubr.msk.f32.gmra.mxu0 %vm389_vm0, %v337_v61  ;;  %v642_v61 = vld [vmem:[%s1677_s3 + $0x18] sm:$0xff] }
  0x6b   : > { %1143 = vmatprep.mubr.msk.f32.mxu0 %vm389_vm0, %v338_v62 }
  0x6e   : > { %1144 = vmatmul.mubr.msk.f32.gmra.mxu0 %vm389_vm0, %v338_v62  ;;  %v643_v62 = vld [vmem:[%s1677_s3 + $0x20] sm:$0xff] }
  0x6f   : > { %1145 = vmatprep.mubr.msk.f32.mxu0 %vm389_vm0, %v339_v63 }
  0x72   : > { %1146 = vmatmul.mubr.msk.f32.gmra.mxu0 %vm389_vm0, %v339_v63  ;;  %v644_v63 = vld [vmem:[%s1677_s3 + $0x28] sm:$0xff] }
  0x73   : > { %1147 = vmatprep.mubr.msk.f32.mxu0 %vm389_vm0, %v340_v0 }
  0x76   : > { %1148 = vmatmul.mubr.msk.f32.gmra.mxu0 %vm389_vm0, %v340_v0  ;;  %v645_v0 = vld [vmem:[%s1677_s3 + $0x30] sm:$0xff] }
  0x92   : > { %v387_v13 = vpop.permute.xlu0 %386 }
  0x93   : > { %v377_v15 = vpop.permute.xlu1 %376 }
  0x96   : > { %v382_v18 = vpop.permute.xlu0 %381 }
  0x97   : > { %v372_v20 = vpop.permute.xlu1 %371 }
  0x9a   : > { %v367_v27 = vpop.permute.xlu0 %366 }
  0x9b   : > { %v362_v29 = vpop.permute.xlu1 %361 }
  0x9e   : > { %v357_v35 = vpop.permute.xlu0 %356 }
  0x9f   : > { %v352_v37 = vpop.permute.xlu1 %351 }
 0x11a   : > { %v576_v2 = vpop.f32.mrf.mxu0 }
 0x11b   : > { %v577_v41 = vadd.f32 %v576_v2, %v352_v37  ;;  %v646_v2 = vld [vmem:[%s1677_s3 + $0x38] sm:$0xff] }
 0x11c   : > { %v578_v3 = vpop.f32.mrf.mxu0 }
 0x11d   : > { %v579_v40 = vadd.f32 %v578_v3, %v352_v37  ;;  %v658_v3 = vpop.permute.xlu0 %657 }
 0x11e   : > { %v582_v4 = vpop.f32.mrf.mxu0 }
 0x11f   : > { %v583_v39 = vadd.f32 %v582_v4, %v357_v35 }
 0x120   : > { %v584_v5 = vpop.f32.mrf.mxu0 }
 0x121   : > { %v585_v38 = vadd.f32 %v584_v5, %v357_v35  ;;  %v663_v5 = vpop.permute.xlu1 %662 }
 0x122   : > { %v588_v6 = vpop.f32.mrf.mxu0 }
 0x123   : > { %v589_v36 = vadd.f32 %v588_v6, %v362_v29 }
 0x124   : > { %v590_v7 = vpop.f32.mrf.mxu0 }
 0x125   : > { %v591_v34 = vadd.f32 %v590_v7, %v362_v29  ;;  %v668_v7 = vpop.permute.xlu0 %667 }
 0x126   : > { %v594_v8 = vpop.f32.mrf.mxu0 }
 0x127   : > { %v595_v33 = vadd.f32 %v594_v8, %v367_v27 }
 0x128   : > { %v596_v9 = vpop.f32.mrf.mxu0 }
 0x129   : > { %v597_v32 = vadd.f32 %v596_v9, %v367_v27 }
 0x12a   : > { %v600_v10 = vpop.f32.mrf.mxu0 }
 0x12b   : > { %v601_v31 = vadd.f32 %v600_v10, %v372_v20  ;;  %v673_v10 = vpop.permute.xlu1 %672 }
 0x12c   : > { %v602_v11 = vpop.f32.mrf.mxu0 }
 0x12d   : > { %v603_v30 = vadd.f32 %v602_v11, %v372_v20 }
 0x12e   : > { %v606_v12 = vpop.f32.mrf.mxu0 }
 0x12f   : > { %v607_v28 = vadd.f32 %v606_v12, %v377_v15 }
 0x130   : > { %v608_v14 = vpop.f32.mrf.mxu0 }
 0x131   : > { %v609_v26 = vadd.f32 %v608_v14, %v377_v15 }
 0x132   : > { %v612_v16 = vpop.f32.mrf.mxu0 }
 0x133   : > { %v613_v25 = vadd.f32 %v612_v16, %v382_v18 }
 0x134   : > { %v614_v17 = vpop.f32.mrf.mxu0 }
 0x135   : > { %v615_v23 = vadd.f32 %v614_v17, %v382_v18 }
 0x136   : > { %v618_v19 = vpop.f32.mrf.mxu0 }
 0x137   : > { %v619_v21 = vadd.f32 %v618_v19, %v387_v13  ;;  %v683_v19 = vpop.permute.xlu1 %682 }
 0x138   : > { %v620_v22 = vpop.f32.mrf.mxu0 }
 0x139   : > { %v621_v24 = vadd.f32 %v620_v22, %v387_v13  ;;  %v678_v13 = vpop.permute.xlu0 %677 }
 0x13b   : > { %1193 = vtanh.f32 %v621_v24  ;;  %v693_v29 = vpop.permute.xlu1 %692 }
 0x13c   : > { %1195 = vtanh.f32 %v619_v21 }
 0x13d   : > { %1197 = vtanh.f32 %v615_v23  ;;  %v688_v23 = vpop.permute.xlu0 %687 }
 0x13e   : > { %1199 = vtanh.f32 %v613_v25 }
 0x13f   : > { %1201 = vtanh.f32 %v609_v26 }
 0x140   : > { %1203 = vtanh.f32 %v607_v28 }
 0x141   : > { %1205 = vtanh.f32 %v603_v30 }
 0x142   : > { %1207 = vtanh.f32 %v601_v31 }
 0x143   : > { %1209 = vtanh.f32 %v597_v32  ;;  %v860_v32 = vpop.permute.xlu0 %859 }
 0x144   : > { %1211 = vtanh.f32 %v595_v33 }
 0x145   : > { %1213 = vtanh.f32 %v591_v34 }
 0x146   : > { %1215 = vtanh.f32 %v589_v36 }
 0x147   : > { %1217 = vtanh.f32 %v585_v38  ;;  %v865_v38 = vpop.permute.xlu1 %864 }
 0x148   : > { %v1194_v42 = vpop.eup %1193  ;;  %1219 = vtanh.f32 %v583_v39 }
 0x149   : > { %v1196_v43 = vpop.eup %1195  ;;  %1221 = vtanh.f32 %v579_v40  ;;  %736 = vmatprep.subr.mxu1 %v1194_v42 }
 0x14a   : > { %v1198_v44 = vpop.eup %1197  ;;  %1223 = vtanh.f32 %v577_v41  ;;  %737 = vmatpush1.msra.mxu1 %v1196_v43  ;;  %v870_v43 = vpop.permute.xlu0 %869 }
 0x14b   : > { %v1200_v45 = vpop.eup %1199  ;;  %738 = vmatprep.subr.mxu1 %v1198_v44 }
 0x14c   : > { %v1202_v46 = vpop.eup %1201  ;;  %739 = vmatpush1.msra.mxu1 %v1200_v45 }
 0x14d   : > { %v1204_v47 = vpop.eup %1203  ;;  %740 = vmatprep.subr.mxu1 %v1202_v46 }
 0x14e   : > { %v1206_v48 = vpop.eup %1205  ;;  %741 = vmatpush1.msra.mxu1 %v1204_v47 }
 0x14f   : > { %v1208_v49 = vpop.eup %1207  ;;  %742 = vmatprep.subr.mxu1 %v1206_v48 }
 0x150   : > { %v1210_v50 = vpop.eup %1209  ;;  %743 = vmatpush1.msra.mxu1 %v1208_v49 }
 0x151   : > { %v1212_v51 = vpop.eup %1211  ;;  %744 = vmatprep.subr.mxu1 %v1210_v50 }
 0x152   : > { %v1214_v52 = vpop.eup %1213  ;;  %745 = vmatpush1.msra.mxu1 %v1212_v51 }
 0x153   : > { %v1216_v53 = vpop.eup %1215  ;;  %746 = vmatprep.subr.mxu1 %v1214_v52 }
 0x154   : > { %v1218_v54 = vpop.eup %1217  ;;  %747 = vmatpush1.msra.mxu1 %v1216_v53  ;;  %v875_v53 = vpop.permute.xlu1 %874 }
 0x155   : > { %v1220_v55 = vpop.eup %1219  ;;  %748 = vmatprep.subr.mxu1 %v1218_v54 }
 0x156   : > { %v1222_v56 = vpop.eup %1221  ;;  %749 = vmatpush1.msra.mxu1 %v1220_v55 }
 0x157   : > { %v1224_v58 = vpop.eup %1223  ;;  %750 = vmatprep.subr.mxu1 %v1222_v56 }
 0x158   : > { %751 = vmatpush1.msra.mxu1 %v1224_v58 }
 0x159   : > { %1087 = vmatmul.mubr.msk.f32.vlgmr.msra.gmra.mxu1 %vm695_vm1, %v639_v57 }
 0x15a   : > { %790 = vmatprep.mubr.f32.mxu1 %v1320_v1 }
 0x15d   : > { %1088 = vmatmul.mubr.msk.f32.gmra.mxu1 %vm695_vm1, %v640_v59  ;;  %v880_v59 = vpop.permute.xlu0 %879 }
 0x15e   : > { %796 = vmatprep.mubr.f32.mxu1 %v1320_v1 }
 0x161   : > { %1089 = vmatmul.mubr.msk.f32.gmra.mxu1 %vm695_vm1, %v641_v60 }
 0x162   : > { %802 = vmatprep.mubr.f32.mxu1 %v1320_v1 }
 0x165   : > { %1090 = vmatmul.mubr.msk.f32.gmra.mxu1 %vm695_vm1, %v642_v61 }
 0x166   : > { %808 = vmatprep.mubr.f32.mxu1 %v1320_v1 }
 0x169   : > { %1091 = vmatmul.mubr.msk.f32.gmra.mxu1 %vm695_vm1, %v643_v62 }
 0x16a   : > { %814 = vmatprep.mubr.f32.mxu1 %v1320_v1 }
 0x16d   : > { %1092 = vmatmul.mubr.msk.f32.gmra.mxu1 %vm695_vm1, %v644_v63 }
 0x16e   : > { %820 = vmatprep.mubr.f32.mxu1 %v1320_v1 }
 0x171   : > { %1093 = vmatmul.mubr.msk.f32.gmra.mxu1 %vm695_vm1, %v645_v0 }
 0x172   : > { %826 = vmatprep.mubr.f32.mxu1 %v1320_v1 }
 0x175   : > { %1094 = vmatmul.mubr.msk.f32.gmra.mxu1 %vm695_vm1, %v646_v2 }
 0x219   : > { %v786_v4 = vpop.f32.mrf.mxu1 }
 0x21a   : > { %v787_v12 = vadd.f32 %v786_v4, %v658_v3 }
 0x21b   : > { %v788_v6 = vpop.f32.mrf.mxu1 }
 0x21c   : > { %v789_v14 = vadd.f32 %v788_v6, %v658_v3  ;;  %1225 = vtanh.f32 %v787_v12 }
 0x21d   : > { %v792_v8 = vpop.f32.mrf.mxu1 }
 0x21e   : > { %v793_v1 = vadd.f32 %v792_v8, %v663_v5  ;;  %1227 = vtanh.f32 %v789_v14  ;;  %v885_v8 = vpop.permute.xlu1 %884  ;;  %v890_v14 = vpop.permute.xlu0 %889 }
 0x21f   : > { %v794_v9 = vpop.f32.mrf.mxu1 }
 0x220   : > { %v795_v16 = vadd.f32 %v794_v9, %v663_v5  ;;  %1229 = vtanh.f32 %v793_v1 }
 0x221   : > { %v798_v11 = vpop.f32.mrf.mxu1 }
 0x222   : > { %v799_v18 = vadd.f32 %v798_v11, %v668_v7  ;;  %1231 = vtanh.f32 %v795_v16 }
 0x223   : > { %v800_v15 = vpop.f32.mrf.mxu1 }
 0x224   : > { %v801_v20 = vadd.f32 %v800_v15, %v668_v7  ;;  %1233 = vtanh.f32 %v799_v18 }
 0x225   : > { %v804_v17 = vpop.f32.mrf.mxu1 }
 0x226   : > { %v805_v22 = vadd.f32 %v804_v17, %v673_v10  ;;  %1235 = vtanh.f32 %v801_v20 }
 0x227   : > { %v806_v21 = vpop.f32.mrf.mxu1 }
 0x228   : > { %v807_v24 = vadd.f32 %v806_v21, %v673_v10  ;;  %1237 = vtanh.f32 %v805_v22 }
 0x229   : > { %v810_v25 = vpop.f32.mrf.mxu1  ;;  %v1226_v37 = vpop.eup %1225 }
 0x22a   : > { %v811_v26 = vadd.f32 %v810_v25, %v678_v13  ;;  %1239 = vtanh.f32 %v807_v24  ;;  %v897_v55 = vmul.f32 %v1226_v37, %v860_v32 }
 0x22b   : > { %v812_v27 = vpop.f32.mrf.mxu1  ;;  %v1228_v40 = vpop.eup %1227 }
 0x22c   : > { %v813_v28 = vadd.f32 %v812_v27, %v678_v13  ;;  %1241 = vtanh.f32 %v811_v26  ;;  %v898_v61 = vmul.f32 %v1228_v40, %v860_v32 }
 0x22d   : > { %v816_v30 = vpop.f32.mrf.mxu1  ;;  %v1230_v42 = vpop.eup %1229 }
 0x22e   : > { %v817_v31 = vadd.f32 %v816_v30, %v683_v19  ;;  %1243 = vtanh.f32 %v813_v28  ;;  %v899_v50 = vmul.f32 %v1230_v42, %v865_v38 }
 0x22f   : > { %v818_v33 = vpop.f32.mrf.mxu1  ;;  %v1232_v45 = vpop.eup %1231 }
 0x230   : > { %1245 = vtanh.f32 %v817_v31  ;;  %v819_v34 = vadd.f32 %v818_v33, %v683_v19  ;;  %v900_v56 = vmul.f32 %v1232_v45, %v865_v38  ;;  %v913_v62 = vadd.f32 %v899_v50, %v897_v55 }
 0x231   : > { %v822_v35 = vpop.f32.mrf.mxu1  ;;  %v1234_v47 = vpop.eup %1233 }
 0x232   : > { %1247 = vtanh.f32 %v819_v34  ;;  %v823_v36 = vadd.f32 %v822_v35, %v688_v23  ;;  %v901_v57 = vmul.f32 %v1234_v47, %v870_v43  ;;  %v926_v3 = vadd.f32 %v900_v56, %v898_v61 }
 0x233   : > { %v824_v39 = vpop.f32.mrf.mxu1  ;;  %v1236_v49 = vpop.eup %1235 }
 0x234   : > { %1249 = vtanh.f32 %v823_v36  ;;  %v825_v41 = vadd.f32 %v824_v39, %v688_v23  ;;  %v902_v63 = vmul.f32 %v1236_v49, %v870_v43  ;;  %v914_v4 = vadd.f32 %v913_v62, %v901_v57  ;;  %v895_v23 = vpop.permute.xlu1 %894 }
 0x235   : > { %v828_v44 = vpop.f32.mrf.mxu1  ;;  %v1238_v52 = vpop.eup %1237  ;;  %v1321_v39 = vmov 1966171168  }
 0x236   : > { %1251 = vtanh.f32 %v825_v41  ;;  %v829_v46 = vadd.f32 %v828_v44, %v693_v29  ;;  %v903_v0 = vmul.f32 %v1238_v52, %v875_v53  ;;  %v927_v9 = vadd.f32 %v926_v3, %v902_v63 }
 0x237   : > { %v830_v48 = vpop.f32.mrf.mxu1  ;;  %v1240_v54 = vpop.eup %1239  ;;  %v947_v40 = vunpack.c.l.s4 %v1321_v39  ;;  %v949_v41 = vlaneseq }
 0x238   : > { %1253 = vtanh.f32 %v829_v46  ;;  %v831_v51 = vadd.f32 %v830_v48, %v693_v29  ;;  %v904_v5 = vmul.f32 %v1240_v54, %v875_v53  ;;  %v915_v10 = vadd.f32 %v914_v4, %v903_v0 }
 0x239   : > { %v1242_v58 = vpop.eup %1241  ;;  %v948_v46 = vunpack.c.0.s8 %v947_v40  ;;  %v950_v47 = vshrl.u32 %v949_v41, 7  ;;  %v940_v48 = vstv %s939_s30  ;;  %vm963_vm2 = vcmp.lt.s32.totalorder %v949_v41, 256 }
 0x23a   : > { %1255 = vtanh.f32 %v831_v51  ;;  %v905_v6 = vmul.f32 %v1242_v58, %v880_v59  ;;  %v928_v15 = vadd.f32 %v927_v9, %v904_v5 }
 0x23b   : > { %v1244_v60 = vpop.eup %1243  ;;  %v951_v52 = vsub.s32 %v948_v46, %v950_v47 }
 0x23c   : > { %v906_v11 = vmul.f32 %v1244_v60, %v880_v59  ;;  %v916_v1 = vadd.f32 %v915_v10, %v905_v6 }
 0x23d   : > { %v1246_v2 = vpop.eup %1245 }
 0x23e   : > { %v907_v12 = vmul.f32 %v1246_v2, %v885_v8  ;;  %v929_v19 = vadd.f32 %v928_v15, %v906_v11 }
 0x23f   : > { %v1248_v7 = vpop.eup %1247 }
 0x240   : > { %v908_v16 = vmul.f32 %v1248_v7, %v885_v8  ;;  %v917_v20 = vadd.f32 %v916_v1, %v907_v12 }
 0x241   : > { %v1250_v13 = vpop.eup %1249 }
 0x242   : > { %v909_v17 = vmul.f32 %v1250_v13, %v890_v14  ;;  %v930_v24 = vadd.f32 %v929_v19, %v908_v16 }
 0x243   : > { %v1252_v18 = vpop.eup %1251 }
 0x244   : > { %v910_v21 = vmul.f32 %v1252_v18, %v890_v14  ;;  %v918_v25 = vadd.f32 %v917_v20, %v909_v17 }
 0x245   : > { %v1254_v22 = vpop.eup %1253 }
 0x246   : > { %v911_v26 = vmul.f32 %v1254_v22, %v895_v23  ;;  %v931_v28 = vadd.f32 %v930_v24, %v910_v21 }
 0x247   : > { %v1256_v27 = vpop.eup %1255 }
 0x248   : > { %v919_v29 = vadd.f32 %v918_v25, %v911_v26  ;;  %v912_v30 = vmul.f32 %v1256_v27, %v895_v23 }
 0x24a   : > { %v920_v31 = vrot.slane %v919_v29, 4  ;;  %v932_v32 = vadd.f32 %v931_v28, %v912_v30 }
 0x24c   : > { %v921_v33 = vadd.f32 %v920_v31, %v919_v29  ;;  %v933_v34 = vrot.slane %v932_v32, 4 }
 0x24e   : > { %v934_v35 = vadd.f32 %v933_v34, %v932_v32  ;;  %v922_v36 = vrot.slane %v921_v33, 2 }
 0x250   : > { %v923_v37 = vadd.f32 %v922_v36, %v921_v33  ;;  %v935_v38 = vrot.slane %v934_v35, 2 }
 0x252   : > { %v924_v42 = vrot.slane %v923_v37, 1  ;;  %v936_v43 = vadd.f32 %v935_v38, %v934_v35 }
 0x254   : > { %v925_v44 = vadd.f32 %v924_v42, %v923_v37  ;;  %v937_v45 = vrot.slane %v936_v43, 1 }
 0x256   : > { %v938_v49 = vadd.f32 %v937_v45, %v936_v43  ;;  %v941_v50 = vadd.f32 %v940_v48, %v925_v44 }
 0x258   : > { %v942_v51 = vadd.f32 %v940_v48, %v938_v49 }
 0x25a   : > { %v945_v53 = vcombine.low %v941_v50, %v942_v51 }
 0x25c   : > { %v952_v54 = vrot.slane %v945_v53, %v951_v52 }
 0x25e   : > { %v959_v55 = vrot.slane %v952_v54, %v951_v52 }
 0x260   : > { %965 = vst.msk [vmem:[%s285_s16] sm:$0x3] %vm963_vm2, %v959_v55 }
 0x261   : > { %1270 = shalt.err (!%p1267_p3)
}
 0x262   : > { %s1271_s25 = scalar_lea.hbm %s979_s19, 32  ;;  %s1275_s30 = scalar_lea.hbm %s1681_s7, 64 }
 0x263   : > { %p1272_p4 = scmp.ne.s32.totalorder %s979_s19, %s1271_s25  ;;  %p1276_p9 = scmp.lt.s32.totalorder %s979_s19, %s1681_s7 }
 0x264   : > { %p1277_p10 = scmp.lt.s32.totalorder %s1275_s30, %s1271_s25 }
 0x265   : > { %p1273_p7 = pnand %p1272_p4, %p1401_p5 }
 0x266   : > { %p1278_p11 = por %p1277_p10, %p1276_p9 }
 0x267   : > { %p1274_p8 = pneg %p1273_p7 }
 0x269   : > { %p1279_p12 = pnand %p1278_p11, %p1274_p8 }
 0x26b   : > { %1282 = shalt.err (!%p1279_p12)
}
 0x26c   : > { %1149 = dma.vmem_to_hbm [thread:$0]  (%p1401_p5), %s982_s10, 32, %s979_s19, %s967_s20  }
 0x26d PF: > { %p1155_p13 = scmp.ge.s32.totalorder %s1317_s29, 2  ;;  %s993_s16 = sand.u32 1, %s1305_s26  }
 0x26e   : > { %s994_s17 = scalar_lea.sflag [#allocation4], %s993_s16 }
 0x26f   : > { %p1152_p0 = pnand %p1155_p13, %p1405_p6 }
 0x271   : > { %p1153_p1 = pneg %p1152_p0 }
 0x273   : > { %1300 = dma.done.wait (%p1153_p1), %s994_s17, 32  }
 0x274   : > { %1302 = vsyncadd (%p1153_p1), %s994_s17, 4294967264  ;;  %p18_p2 = scmp.ge.s32.totalorder %s1389_s8, 4   ;;  %s1684_s26 = smov %s1309_s27 }
 0x275   : > { %s1685_s27 = smov %s1313_s28  ;;  %s1686_s28 = smov %s1399_s11 }
 0x276   : > { %s1687_s29 = smov %s1389_s8  ;;  %20 = sbr.rel (!%p18_p2) target bundleno = 5 (0x5), region = 83 }
 0x27b   :  { %999 = vsyncpa [#allocation4], 1 }
 0x27c   :  { %1001 = vsyncpa [#allocation4 + $0x1], 1 }

</bundles_post_ra>
